<compile_context>
chip_gen: v7x
topology: tpu7x:2x2x1
jax: 0.10.0
libtpu: 0.0.40
codegen_flags: <defaults>
</compile_context>

<pallas_src>
import functools

import jax
import jax.numpy as jnp
from jax.experimental import pallas as pl
from jax.experimental.pallas import tpu as pltpu


def _attention_kernel(rnn_ref, fh_ref, wa_ref, ba_ref, wc1_t_ref, wc2_t_ref,
                      bc_ref, hidden_out_ref, attn_out_ref, *, approx_recip):
    # Views for one batch tile:
    #   rnn_ref:   (TB, S, H)  compute dtype (f32 or bf16)
    #   fh_ref:    (TB, H)     compute dtype
    #   wa_ref:    (H, H)      attn.weight (PyTorch (out, in) layout, NOT transposed)
    #   wc1_t_ref: (H, H)      concat_linear.weight[:, :H].T  (acts on context)
    #   wc2_t_ref: (H, H)      concat_linear.weight[:, H:].T  (acts on final hidden)
    #   ba_ref, bc_ref: (1, H) f32 biases
    f32 = jnp.float32
    x = rnn_ref[...]                                   # (TB, S, H)
    fh = fh_ref[...]                                   # (TB, H)

    # --- g[b, h] = sum_o fh[b, o] * wa[o, h]  (tiny MXU matmul, f32 acc) ----
    g = jnp.dot(fh, wa_ref[...], preferred_element_type=f32)            # (TB, H)
    # --- c[b] = <ba, fh[b]>  (scalar bias term of the scores) ---------------
    c = jnp.sum(ba_ref[...] * fh.astype(f32), axis=-1, keepdims=True)   # (TB, 1)

    # --- scores[b, s] = <x[b, s], g[b]> + c[b]  (VPU mul + lane reduce) -----
    scores = jnp.sum(x.astype(f32) * g[:, None, :], axis=-1) + c        # (TB, S)

    # --- softmax over the sequence dim (f32) --------------------------------
    m = jnp.max(scores, axis=-1, keepdims=True)
    e = jnp.exp(scores - m)
    denom = jnp.sum(e, axis=-1, keepdims=True)
    if approx_recip:
        # EUP approximate reciprocal (otherwise-idle slot); ~1e-3 rel. error.
        attn = e * pl.reciprocal(denom, approx=True)
    else:
        attn = e / denom

    # --- context[b, :] = sum_s attn[b, s] * x[b, s, :] -----------------------
    # Multiply in the compute dtype (bf16 VALU on v6e/v7x), accumulate in f32.
    ctx = jnp.sum(attn.astype(x.dtype)[:, :, None] * x, axis=1, dtype=f32)  # (TB, H)

    # --- concat Linear (wc pre-split, no in-kernel concat / slicing) --------
    wdt = wc1_t_ref.dtype
    pre = (jnp.dot(ctx.astype(wdt), wc1_t_ref[...], preferred_element_type=f32)
           + jnp.dot(fh, wc2_t_ref[...], preferred_element_type=f32)
           + bc_ref[...])                                              # (TB, H)

    hidden_out_ref[...] = jnp.tanh(pre).astype(hidden_out_ref.dtype)
    attn_out_ref[...] = attn.astype(attn_out_ref.dtype)


def attention_forward(rnn_outputs, final_hidden_state, wa, ba, wc, bc,
                      *, block_b=512, compute_dtype=jnp.bfloat16,
                      approx_recip=True, vmem_limit_bytes=None):
    """Pallas-TPU forward of the PyTorch Attention module.

    wa: (H, H)   attn.weight            (PyTorch (out, in) layout)
    ba: (H,)     attn.bias
    wc: (H, 2H)  concat_linear.weight   (PyTorch (out, in) layout)
    bc: (H,)     concat_linear.bias
    Returns (attn_hidden (B, H) f32, attn_weights (B, S) f32).
    """
    B, S, H = rnn_outputs.shape
    assert final_hidden_state.shape == (B, H)
    assert wa.shape == (H, H) and ba.shape == (H,)
    assert wc.shape == (H, 2 * H) and bc.shape == (H,)

    f32 = jnp.float32
    itemsize = jnp.dtype(compute_dtype).itemsize

    # ---- batch tile selection ----------------------------------------------
    # Rough double-buffered VMEM footprint per batch row: streamed inputs in
    # the compute dtype, f32 outputs, plus f32 in-kernel temporaries.  Clamp
    # the tile to a conservative 8 MiB so we stay inside every generation's
    # default scoped VMEM limit (v5e: 16 MiB) without extra flags.
    bytes_per_row = (2 * (S * H + H) * itemsize      # double-buffered inputs
                     + 2 * (H + S) * 4               # double-buffered outputs
                     + (S * H + 4 * H + 4 * S) * 4)  # f32 working set
    vmem_budget = 8 * 1024 * 1024
    max_tb = max(8, (vmem_budget // bytes_per_row) // 8 * 8)

    tb = max(8, int(block_b))
    tb = (tb + 7) // 8 * 8           # multiple of 8 (sublane-dense fh/outputs)
    tb = min(tb, max_tb)
    if tb >= B:
        # One block covering the whole batch: block == full array dim, which is
        # always a legal block shape (no padding, no ragged handling needed).
        tb = B
        num_tiles = 1
    else:
        # tb is a multiple of 8 and <= B; the last block may be ragged, which
        # Pallas handles by clipping the DMA and masking OOB output rows.
        num_tiles = pl.cdiv(B, tb)

    rnn = rnn_outputs.astype(compute_dtype)
    fh = final_hidden_state.astype(compute_dtype)

    # Pre-transpose / pre-split weights ONCE outside the kernel.
    wa_c = wa.astype(compute_dtype)              # (H, H) used as fh @ Wa
    wc1_t = wc[:, :H].T.astype(compute_dtype)    # (H, H) acts on context
    wc2_t = wc[:, H:].T.astype(compute_dtype)    # (H, H) acts on final hidden
    ba2 = ba.reshape(1, H).astype(f32)
    bc2 = bc.reshape(1, H).astype(f32)

    out_shapes = (
        jax.ShapeDtypeStruct((B, H), f32),   # attn_hidden
        jax.ShapeDtypeStruct((B, S), f32),   # attn_weights
    )

    grid_spec = pltpu.PrefetchScalarGridSpec(
        num_scalar_prefetch=0,
        grid=(num_tiles,),
        in_specs=[
            pl.BlockSpec((tb, S, H), lambda i: (i, 0, 0)),   # rnn_outputs
            pl.BlockSpec((tb, H), lambda i: (i, 0)),         # final hidden
            pl.BlockSpec((H, H), lambda i: (0, 0)),          # attn.weight
            pl.BlockSpec((1, H), lambda i: (0, 0)),          # attn bias
            pl.BlockSpec((H, H), lambda i: (0, 0)),          # wc[:, :H].T
            pl.BlockSpec((H, H), lambda i: (0, 0)),          # wc[:, H:].T
            pl.BlockSpec((1, H), lambda i: (0, 0)),          # concat bias
        ],
        out_specs=[
            pl.BlockSpec((tb, H), lambda i: (i, 0)),         # attn_hidden
            pl.BlockSpec((tb, S), lambda i: (i, 0)),         # attn_weights
        ],
    )

    kernel = functools.partial(_attention_kernel, approx_recip=approx_recip)

    compiler_params = pltpu.CompilerParams(
        dimension_semantics=("parallel",),   # batch tiles split across v7x TCs
        vmem_limit_bytes=vmem_limit_bytes)

    hidden, attn = pl.pallas_call(
        kernel,
        out_shape=out_shapes,
        grid_spec=grid_spec,
        compiler_params=compiler_params,
    )(rnn, fh, wa_c, ba2, wc1_t, wc2_t, bc2)

    return hidden, attn


def _reference(rnn_outputs, final_hidden_state, wa, ba, wc, bc):
    # Pure-JAX reference mirroring the PyTorch forward (f32).
    aw = jnp.einsum("bsh,oh->bso", rnn_outputs, wa) + ba
    scores = jnp.einsum("bso,bo->bs", aw, final_hidden_state)
    attn = jax.nn.softmax(scores, axis=1)
    context = jnp.einsum("bsh,bs->bh", rnn_outputs, attn)
    cat = jnp.concatenate([context, final_hidden_state], axis=1)
    hidden = jnp.tanh(cat @ wc.T + bc)
    return hidden, attn


def _make_inputs(key, B, S, H):
    k1, k2, k3, k4, k5, k6 = jax.random.split(key, 6)
    rnn = jax.random.normal(k1, (B, S, H), dtype=jnp.float32)
    fh = jax.random.normal(k2, (B, H), dtype=jnp.float32)
    wa = jax.random.normal(k3, (H, H), dtype=jnp.float32) * 0.1
    ba = jax.random.normal(k4, (H,), dtype=jnp.float32) * 0.1
    wc = jax.random.normal(k5, (H, 2 * H), dtype=jnp.float32) * 0.1
    bc = jax.random.normal(k6, (H,), dtype=jnp.float32) * 0.1
    return rnn, fh, wa, ba, wc, bc


if __name__ == "__main__":
    S, H = 8, 32
    key = jax.random.PRNGKey(0)
    k_a, k_b, k_c = jax.random.split(key, 3)

    # 1) Tiny batch (B=2 < 8 -> one exact-size block), f32, exact reciprocal.
    args = _make_inputs(k_a, 2, S, H)
    hid, att = attention_forward(*args, compute_dtype=jnp.float32,
                                 approx_recip=False)
    jax.block_until_ready((hid, att))
    ref_hid, ref_att = _reference(*args)
    assert hid.shape == (2, H) and att.shape == (2, S)
    assert jnp.allclose(hid, ref_hid, atol=1e-5, rtol=1e-5)
    assert jnp.allclose(att, ref_att, atol=1e-5, rtol=1e-5)

    # 2) Ragged batch (B=20, tb=8 -> 3 grid steps, clipped last block), f32.
    args = _make_inputs(k_b, 20, S, H)
    hid, att = attention_forward(*args, block_b=8, compute_dtype=jnp.float32,
                                 approx_recip=False)
    jax.block_until_ready((hid, att))
    ref_hid, ref_att = _reference(*args)
    assert hid.shape == (20, H) and att.shape == (20, S)
    assert jnp.allclose(hid, ref_hid, atol=1e-5, rtol=1e-5)
    assert jnp.allclose(att, ref_att, atol=1e-5, rtol=1e-5)

    # 3) Default perf config: bf16 inputs/weights, large tile, approx recip.
    #    Compare against the f32 reference run on bf16-quantized inputs so the
    #    tolerance reflects kernel error, not the deliberate input quantization.
    args = _make_inputs(k_c, 256, S, H)
    hid, att = attention_forward(*args)          # block_b=512 -> single tile
    jax.block_until_ready((hid, att))
    q_args = tuple(a.astype(jnp.bfloat16).astype(jnp.float32) for a in args)
    ref_hid, ref_att = _reference(*q_args)
    assert hid.shape == (256, H) and att.shape == (256, S)
    assert jnp.allclose(hid, ref_hid, atol=5e-2, rtol=5e-2)
    assert jnp.allclose(att, ref_att, atol=5e-2, rtol=5e-2)

    print("KERNEL_OK")
</pallas_src>

<mosaic_0001>
module attributes {stable_mosaic.version = 11 : i64} {
  func.func @_attention_kernel(%arg0: i32, %arg1: memref<2x8x32xf32, #tpu.memory_space<vmem>>, %arg2: memref<2x32xf32, #tpu.memory_space<vmem>>, %arg3: memref<32x32xf32, #tpu.memory_space<vmem>>, %arg4: memref<1x32xf32, #tpu.memory_space<vmem>>, %arg5: memref<32x32xf32, #tpu.memory_space<vmem>>, %arg6: memref<32x32xf32, #tpu.memory_space<vmem>>, %arg7: memref<1x32xf32, #tpu.memory_space<vmem>>, %arg8: memref<2x32xf32, #tpu.memory_space<vmem>>, %arg9: memref<2x8xf32, #tpu.memory_space<vmem>>) attributes {dimension_semantics = [#tpu.dimension_semantics<parallel>], iteration_bounds = array<i64: 1>, scalar_prefetch = 0 : i64, scratch_operands = 0 : i64, tpu.core_type = #tpu.core_type<tc>, window_params = [{transform_indices = @transform_0, window_bounds = array<i64: 2, 8, 32>}, {transform_indices = @transform_1, window_bounds = array<i64: 2, 32>}, {pipeline_mode = #tpu.pipeline_mode<synchronous>, transform_indices = @transform_2, window_bounds = array<i64: 32, 32>}, {pipeline_mode = #tpu.pipeline_mode<synchronous>, transform_indices = @transform_3, window_bounds = array<i64: 1, 32>}, {pipeline_mode = #tpu.pipeline_mode<synchronous>, transform_indices = @transform_4, window_bounds = array<i64: 32, 32>}, {pipeline_mode = #tpu.pipeline_mode<synchronous>, transform_indices = @transform_5, window_bounds = array<i64: 32, 32>}, {pipeline_mode = #tpu.pipeline_mode<synchronous>, transform_indices = @transform_6, window_bounds = array<i64: 1, 32>}, {transform_indices = @transform_7, window_bounds = array<i64: 2, 32>}, {transform_indices = @transform_8, window_bounds = array<i64: 2, 8>}]} {
    %c0 = arith.constant 0 : index
    %c0_0 = arith.constant 0 : index
    %c0_1 = arith.constant 0 : index
    %0 = vector.load %arg1[%c0, %c0_0, %c0_1] : memref<2x8x32xf32, #tpu.memory_space<vmem>>, vector<2x8x32xf32>
    %c0_2 = arith.constant 0 : index
    %c0_3 = arith.constant 0 : index
    %1 = vector.load %arg2[%c0_2, %c0_3] : memref<2x32xf32, #tpu.memory_space<vmem>>, vector<2x32xf32>
    %c0_4 = arith.constant 0 : index
    %c0_5 = arith.constant 0 : index
    %2 = vector.load %arg3[%c0_4, %c0_5] : memref<32x32xf32, #tpu.memory_space<vmem>>, vector<32x32xf32>
    %cst = arith.constant dense<0.000000e+00> : vector<2x32xf32>
    %3 = tpu.matmul %1, %2, %cst {dimension_numbers = #tpu.dot_dimension_numbers<[1], [0], [0], [1], [0, 0, 1, 1], [], []>} : vector<2x32xf32>, vector<32x32xf32>, vector<2x32xf32> -> vector<2x32xf32>
    %c0_6 = arith.constant 0 : index
    %c0_7 = arith.constant 0 : index
    %4 = vector.load %arg4[%c0_6, %c0_7] : memref<1x32xf32, #tpu.memory_space<vmem>>, vector<1x32xf32>
    %5 = vector.broadcast %4 : vector<1x32xf32> to vector<2x32xf32>
    %6 = arith.mulf %5, %1 : vector<2x32xf32>
    %cst_8 = arith.constant dense<0.000000e+00> : vector<2xf32>
    %7 = vector.multi_reduction <add>, %6, %cst_8 [1] : vector<2x32xf32> to vector<2xf32>
    %8 = vector.shape_cast %7 : vector<2xf32> to vector<2x1xf32>
    %9 = vector.shape_cast %3 : vector<2x32xf32> to vector<2x1x32xf32>
    %10 = vector.broadcast %9 : vector<2x1x32xf32> to vector<2x8x32xf32>
    %11 = arith.mulf %0, %10 : vector<2x8x32xf32>
    %cst_9 = arith.constant dense<0.000000e+00> : vector<2x8xf32>
    %12 = vector.multi_reduction <add>, %11, %cst_9 [2] : vector<2x8x32xf32> to vector<2x8xf32>
    %13 = vector.broadcast %8 : vector<2x1xf32> to vector<2x8xf32>
    %14 = arith.addf %12, %13 : vector<2x8xf32>
    %cst_10 = arith.constant dense<0xFF800000> : vector<2xf32>
    %15 = vector.multi_reduction <maximumf>, %14, %cst_10 [1] : vector<2x8xf32> to vector<2xf32>
    %16 = vector.shape_cast %15 : vector<2xf32> to vector<2x1xf32>
    %17 = vector.broadcast %16 : vector<2x1xf32> to vector<2x8xf32>
    %18 = arith.subf %14, %17 : vector<2x8xf32>
    %19 = math.exp %18 : vector<2x8xf32>
    %cst_11 = arith.constant dense<0.000000e+00> : vector<2xf32>
    %20 = vector.multi_reduction <add>, %19, %cst_11 [1] : vector<2x8xf32> to vector<2xf32>
    %21 = vector.shape_cast %20 : vector<2xf32> to vector<2x1xf32>
    %22 = vector.broadcast %21 : vector<2x1xf32> to vector<2x8xf32>
    %23 = arith.divf %19, %22 : vector<2x8xf32>
    %24 = vector.shape_cast %23 : vector<2x8xf32> to vector<2x8x1xf32>
    %25 = vector.broadcast %24 : vector<2x8x1xf32> to vector<2x8x32xf32>
    %26 = arith.mulf %25, %0 : vector<2x8x32xf32>
    %cst_12 = arith.constant dense<0.000000e+00> : vector<2x32xf32>
    %27 = vector.multi_reduction <add>, %26, %cst_12 [1] : vector<2x8x32xf32> to vector<2x32xf32>
    %c0_13 = arith.constant 0 : index
    %c0_14 = arith.constant 0 : index
    %28 = vector.load %arg5[%c0_13, %c0_14] : memref<32x32xf32, #tpu.memory_space<vmem>>, vector<32x32xf32>
    %cst_15 = arith.constant dense<0.000000e+00> : vector<2x32xf32>
    %29 = tpu.matmul %27, %28, %cst_15 {dimension_numbers = #tpu.dot_dimension_numbers<[1], [0], [0], [1], [0, 0, 1, 1], [], []>} : vector<2x32xf32>, vector<32x32xf32>, vector<2x32xf32> -> vector<2x32xf32>
    %c0_16 = arith.constant 0 : index
    %c0_17 = arith.constant 0 : index
    %30 = vector.load %arg6[%c0_16, %c0_17] : memref<32x32xf32, #tpu.memory_space<vmem>>, vector<32x32xf32>
    %cst_18 = arith.constant dense<0.000000e+00> : vector<2x32xf32>
    %31 = tpu.matmul %1, %30, %cst_18 {dimension_numbers = #tpu.dot_dimension_numbers<[1], [0], [0], [1], [0, 0, 1, 1], [], []>} : vector<2x32xf32>, vector<32x32xf32>, vector<2x32xf32> -> vector<2x32xf32>
    %32 = arith.addf %29, %31 : vector<2x32xf32>
    %c0_19 = arith.constant 0 : index
    %c0_20 = arith.constant 0 : index
    %33 = vector.load %arg7[%c0_19, %c0_20] : memref<1x32xf32, #tpu.memory_space<vmem>>, vector<1x32xf32>
    %34 = vector.broadcast %33 : vector<1x32xf32> to vector<2x32xf32>
    %35 = arith.addf %32, %34 : vector<2x32xf32>
    %36 = math.tanh %35 : vector<2x32xf32>
    %c0_21 = arith.constant 0 : index
    %c0_22 = arith.constant 0 : index
    %37 = vector.load %arg8[%c0_21, %c0_22] : memref<2x32xf32, #tpu.memory_space<vmem>>, vector<2x32xf32>
    tpu.vector_store %arg8[%c0_21, %c0_22], %36 {strides = array<i32>} : memref<2x32xf32, #tpu.memory_space<vmem>>, vector<2x32xf32>,
    %c0_23 = arith.constant 0 : index
    %c0_24 = arith.constant 0 : index
    %38 = vector.load %arg9[%c0_23, %c0_24] : memref<2x8xf32, #tpu.memory_space<vmem>>, vector<2x8xf32>
    tpu.vector_store %arg9[%c0_23, %c0_24], %23 {strides = array<i32>} : memref<2x8xf32, #tpu.memory_space<vmem>>, vector<2x8xf32>,
    return
  }
  func.func @transform_0(%arg0: i32) -> (i32, i32, i32) {
    %c0_i32 = arith.constant 0 : i32
    %c0_i32_0 = arith.constant 0 : i32
    %c0_i32_1 = arith.constant 0 : i32
    return %arg0, %c0_i32, %c0_i32_0 : i32, i32, i32
  }
  func.func @transform_1(%arg0: i32) -> (i32, i32) {
    %c0_i32 = arith.constant 0 : i32
    %c0_i32_0 = arith.constant 0 : i32
    return %arg0, %c0_i32 : i32, i32
  }
  func.func @transform_2(%arg0: i32) -> (i32, i32) {
    %c0_i32 = arith.constant 0 : i32
    %c0_i32_0 = arith.constant 0 : i32
    %c0_i32_1 = arith.constant 0 : i32
    return %c0_i32, %c0_i32_0 : i32, i32
  }
  func.func @transform_3(%arg0: i32) -> (i32, i32) {
    %c0_i32 = arith.constant 0 : i32
    %c0_i32_0 = arith.constant 0 : i32
    %c0_i32_1 = arith.constant 0 : i32
    return %c0_i32, %c0_i32_0 : i32, i32
  }
  func.func @transform_4(%arg0: i32) -> (i32, i32) {
    %c0_i32 = arith.constant 0 : i32
    %c0_i32_0 = arith.constant 0 : i32
    %c0_i32_1 = arith.constant 0 : i32
    return %c0_i32, %c0_i32_0 : i32, i32
  }
  func.func @transform_5(%arg0: i32) -> (i32, i32) {
    %c0_i32 = arith.constant 0 : i32
    %c0_i32_0 = arith.constant 0 : i32
    %c0_i32_1 = arith.constant 0 : i32
    return %c0_i32, %c0_i32_0 : i32, i32
  }
  func.func @transform_6(%arg0: i32) -> (i32, i32) {
    %c0_i32 = arith.constant 0 : i32
    %c0_i32_0 = arith.constant 0 : i32
    %c0_i32_1 = arith.constant 0 : i32
    return %c0_i32, %c0_i32_0 : i32, i32
  }
  func.func @transform_7(%arg0: i32) -> (i32, i32) {
    %c0_i32 = arith.constant 0 : i32
    %c0_i32_0 = arith.constant 0 : i32
    return %arg0, %c0_i32 : i32, i32
  }
  func.func @transform_8(%arg0: i32) -> (i32, i32) {
    %c0_i32 = arith.constant 0 : i32
    %c0_i32_0 = arith.constant 0 : i32
    return %arg0, %c0_i32 : i32, i32
  }
}

</mosaic_0001>

<bundles_post_ra>
// kernel: tpu_custom_call.1
= control target key start
LH: loop header
LB: loop body
LE: loop exit
PB: predicated region body
PF: predicated region fallthrough
CT: control target
= control target key end

     0   :  { %14 = vsyncpa [#allocation3], 0  ;;  %s990_s0 = inlined_call_operand.hbm [shape: f32[2,8,32], index: 0, kind: input, shape index: {}]   ;;  %s991_s1 = inlined_call_operand.vmem [shape: f32[2,32], index: 1, kind: input, shape index: {}]   ;;  %s992_s2 = inlined_call_operand.hbm [shape: f32[32,32], index: 2, kind: input, shape index: {}]   ;;  %s993_s3 = inlined_call_operand.vmem [shape: f32[1,32], index: 3, kind: input, shape index: {}]   ;;  %s994_s4 = inlined_call_operand.hbm [shape: f32[32,32], index: 4, kind: input, shape index: {}]   ;;  %s995_s5 = inlined_call_operand.hbm [shape: f32[32,32], index: 5, kind: input, shape index: {}]   ;;  %s996_s6 = inlined_call_operand.vmem [shape: f32[1,32], index: 6, kind: input, shape index: {}]   ;;  %s997_s7 = inlined_call_operand.hbm [shape: f32[2,32], index: 7, kind: output, shape index: {0}]   ;;  %s998_s8 = inlined_call_operand.hbm [shape: f32[2,8], index: 8, kind: output, shape index: {1}]  }
   0x1   :  { %15 = vsyncpa [#allocation6], 0 }
   0x2   :  { %16 = vsyncpa [#allocation9], 0 }
   0x3   :  { %17 = vsyncpa [#allocation4], 0 }
   0x4   :  { %18 = vsyncpa [#allocation12], 0  ;;  %s779_s27 = smov [#allocation5]   ;;  %s780_s29 = smov [#allocation2]  }
   0x5   :  { %s38_s28 = sshll.u32 %s779_s27, 4  ;;  %s24_s30 = sshll.u32 %s780_s29, 4  ;;  %s39_s28 = int_to_ptr.vmem [resolvable:$true] %s38_s28  ;;  %s837_s30 = int_to_ptr.vmem [resolvable:$true] %s24_s30 }
   0x6   :  { %s637_s11 = scalar_lea.hbm %s992_s2, 512 }
   0x7   :  { %p638_p0 = scmp.ne.s32.totalorder %s992_s2, %s637_s11  ;;  %p641_p1 = scmp.lt.u32.totalorder %s637_s11, %s992_s2 }
   0x9   :  { %p643_p2 = pnand %p641_p1, %p638_p0 }
   0xb   :  { %646 = shalt.err (!%p643_p2)
}
   0xc   :  { %s647_s16 = scalar_lea.vmem %s39_s28, 512  ;;  %p652_p4 = scmp.lt.s32.totalorder %s39_s28, %s39_s28 }
   0xd   :  { %p648_p3 = scmp.ne.s32.totalorder %s39_s28, %s647_s16  ;;  %p653_p5 = scmp.lt.s32.totalorder %s647_s16, %s647_s16 }
   0xf   :  { %p654_p6 = por %p653_p5, %p652_p4 }
  0x11   :  { %p655_p7 = pnand %p654_p6, %p648_p3 }
  0x13   :  { %658 = shalt.err (!%p655_p7)
}
  0x14   :  { %s781_s17 = smov 128   ;;  %s782_s18 = smov 8  }
  0x15   :  { %44 = dma.hbm_to_vmem [thread:$0]  %s992_s2, 512, %s39_s28, [#allocation6], %s781_s17, %s781_s17, %s782_s18  }
  0x16   :  { %s659_s23 = scalar_lea.hbm %s990_s0, 256 }
  0x17   :  { %p660_p8 = scmp.ne.s32.totalorder %s990_s0, %s659_s23  ;;  %p663_p9 = scmp.lt.u32.totalorder %s659_s23, %s990_s0 }
  0x19   :  { %p665_p10 = pnand %p663_p9, %p660_p8 }
  0x1b   :  { %668 = shalt.err (!%p665_p10)
}
  0x1c   :  { %s669_s29 = scalar_lea.vmem %s837_s30, 256  ;;  %p674_p12 = scmp.lt.s32.totalorder %s837_s30, %s837_s30 }
  0x1d   :  { %p670_p11 = scmp.ne.s32.totalorder %s837_s30, %s669_s29  ;;  %p675_p13 = scmp.lt.s32.totalorder %s669_s29, %s669_s29 }
  0x1f   :  { %p676_p0 = por %p675_p13, %p674_p12 }
  0x21   :  { %p677_p1 = pnand %p676_p0, %p670_p11 }
  0x23   :  { %680 = shalt.err (!%p677_p1)
}
  0x24   :  { %30 = dma.hbm_to_vmem [thread:$0]  %s990_s0, 256, %s837_s30, [#allocation3], %s781_s17, %s781_s17, %s782_s18  }
  0x25   :  { %s783_s9 = smov [#allocation7]   ;;  %s784_s11 = smov [#allocation8]  }
  0x26   :  { %s52_s10 = sshll.u32 %s783_s9, 4  ;;  %s64_s12 = sshll.u32 %s784_s11, 4  ;;  %s53_s10 = int_to_ptr.vmem [resolvable:$true] %s52_s10  ;;  %s874_s12 = int_to_ptr.vmem [resolvable:$true] %s64_s12 }
  0x27   :  { %s681_s15 = scalar_lea.hbm %s994_s4, 512 }
  0x28   :  { %p682_p2 = scmp.ne.s32.totalorder %s994_s4, %s681_s15  ;;  %p685_p3 = scmp.lt.u32.totalorder %s681_s15, %s994_s4 }
  0x2a   :  { %p687_p4 = pnand %p685_p3, %p682_p2 }
  0x2c   :  { %690 = shalt.err (!%p687_p4)
}
  0x2d   :  { %s691_s0 = scalar_lea.vmem %s53_s10, 512  ;;  %p696_p6 = scmp.lt.s32.totalorder %s53_s10, %s53_s10 }
  0x2e   :  { %p692_p5 = scmp.ne.s32.totalorder %s53_s10, %s691_s0  ;;  %p697_p7 = scmp.lt.s32.totalorder %s691_s0, %s691_s0 }
  0x30   :  { %p698_p8 = por %p697_p7, %p696_p6 }
  0x32   :  { %p699_p9 = pnand %p698_p8, %p692_p5 }
  0x34   :  { %702 = shalt.err (!%p699_p9)
}
  0x35   :  { %58 = dma.hbm_to_vmem [thread:$0]  %s994_s4, 512, %s53_s10, [#allocation6], %s781_s17, %s781_s17, %s782_s18  }
  0x36   :  { %s703_s25 = scalar_lea.hbm %s995_s5, 512 }
  0x37   :  { %p704_p10 = scmp.ne.s32.totalorder %s995_s5, %s703_s25  ;;  %p707_p11 = scmp.lt.u32.totalorder %s703_s25, %s995_s5 }
  0x39   :  { %p709_p12 = pnand %p707_p11, %p704_p10 }
  0x3b   :  { %712 = shalt.err (!%p709_p12)
}
  0x3c   :  { %s713_s28 = scalar_lea.vmem %s874_s12, 512  ;;  %p718_p0 = scmp.lt.s32.totalorder %s874_s12, %s874_s12 }
  0x3d   :  { %p714_p13 = scmp.ne.s32.totalorder %s874_s12, %s713_s28  ;;  %p719_p1 = scmp.lt.s32.totalorder %s713_s28, %s713_s28 }
  0x3f   :  { %p720_p2 = por %p719_p1, %p718_p0 }
  0x41   :  { %p721_p3 = pnand %p720_p2, %p714_p13 }
  0x43   :  { %724 = shalt.err (!%p721_p3)
}
  0x44   :  { %70 = dma.hbm_to_vmem [thread:$0]  %s995_s5, 512, %s874_s12, [#allocation9], %s781_s17, %s781_s17, %s782_s18  }
  0x45   :  { %769 = dma.done.wait [#allocation3], 256  }
  0x46   :  { %770 = vsyncadd [#allocation3], 4294967040 }
  0x47   :  { %771 = dma.done.wait [#allocation6], 1024  }
  0x48   :  { %772 = vsyncadd [#allocation6], 4294966272 }
  0x49   :  { %773 = dma.done.wait [#allocation9], 512  }
  0x4a   :  { %774 = vsyncadd [#allocation9], 4294966784  ;;  %v785_v0 = vmov 0.0|0.0   ;;  %vm786_vm0 = vmmov 0   ;;  %v787_v1 = vmov 0.0   ;;  %v88_v2 = vld [vmem:[#allocation5] sm:$0xff]  ;;  %v182_v14 = vlaneseq }
  0x4b   :  { %594 = vmatprep.subr.bf16.mxu0 %v785_v0  ;;  %569 = vmatprep.mubr.msk.f32.mxu0 %vm786_vm0, %v787_v1  ;;  %v89_v3 = vld [vmem:[#allocation5 + $0x8] sm:$0xff]  ;;  %v90_v4 = vld [vmem:[#allocation5 + $0x10] sm:$0xff]  ;;  %v91_v6 = vld [vmem:[#allocation5 + $0x18] sm:$0xff]  ;;  %vm92_vm1 = vcmask 261120   ;;  %vm174_vm2 = vcmask 254976   ;;  %v789_v33 = vmov 0  }
  0x4c   :  { %600 = vmatprep.subr.bf16.mxu1 %v785_v0  ;;  %580 = vmatprep.mubr.msk.f32.mxu1 %vm786_vm0, %v787_v1  ;;  %v595_v5 = vpack.c.bf16 %v89_v3, %v88_v2  ;;  %v598_v7 = vpack.c.bf16 %v91_v6, %v90_v4  ;;  %v919_v8 = vld [vmem:[%s991_s1] sm:$0x3]  ;;  %v788_v12 = vmov 1966171168   ;;  %v183_v16 = vshrl.u32 %v182_v14, 7  ;;  %v932_v27 = vld [vmem:[#allocation2 + $0x8] sm:$0xff] }
  0x4d   :  { %v542_v9 = vld [vmem:[%s993_s3] ss:$0 sm:$0xff]  ;;  %v180_v13 = vunpack.c.l.s4 %v788_v12  ;;  %625 = vset.pattern.permute.xlu1 %v789_v33  ;;  %626 = vset.pattern.permute.xlu0 %v789_v33  ;;  %v241_v42 = vand.u32 127, %v182_v14  ;;  %vm250_vm3 = vcmask 1041409   ;;  %vm253_vm4 = vcmask 58368   ;;  %v337_v14 = vld [vmem:[#allocation7 + $0x8] sm:$0xff] }
  0x4e   :  { %596 = vmatpush3.bf16.msra.mxu0 %v595_v5  ;;  %v173_v10 = vmul.f32 %v542_v9, %v919_v8  ;;  %v203_v21 = vsub.s32 0, %v183_v16  ;;  %v930_v24 = vld [vmem:[#allocation2] sm:$0xff]  ;;  %v226_v35 = vsub.s32 1, %v183_v16  ;;  %s790_s1 = smov [#allocation11]  }
  0x4f   :  { %597 = vmatprep.subr.bf16.mxu0 %v785_v0  ;;  %v181_v15 = vunpack.c.0.s8 %v180_v13  ;;  %v938_v43 = vsub.s32 %v241_v42, %v183_v16  ;;  %v336_v13 = vld [vmem:[#allocation7] sm:$0xff]  ;;  %s526_s3 = sshll.u32 %s790_s1, 4  ;;  %s527_s3 = int_to_ptr.vmem [resolvable:$true] %s526_s3 }
  0x50   :  { %v175_v11 = vsel %vm174_vm2, %v173_v10, 0.0  ;;  %v340_v10 = vld [vmem:[#allocation8] sm:$0xff]  ;;  %s725_s11 = scalar_lea.vmem %s527_s3, 32  ;;  %p730_p5 = scmp.lt.s32.totalorder %s527_s3, %s527_s3 }
  0x51   :  { %176 = vadd.xlane.f32.xlu0 %v175_v11  ;;  %v184_v17 = vsub.s32 %v181_v15, %v183_v16  ;;  %v341_v11 = vld [vmem:[#allocation8 + $0x8] sm:$0xff]  ;;  %v607_v15 = vpack.c.bf16 %v337_v14, %v336_v13  ;;  %v342_v16 = vld [vmem:[#allocation8 + $0x10] sm:$0xff]  ;;  %p726_p4 = scmp.ne.s32.totalorder %s527_s3, %s725_s11  ;;  %p731_p6 = scmp.lt.s32.totalorder %s725_s11, %s725_s11 }
  0x52   :  { %599 = vmatpush3.bf16.msra.mxu0 %v598_v7  ;;  %v601_v12 = vpack.c.bf16 %v341_v11, %v340_v10 }
  0x53   :  { %606 = vmatprep.subr.bf16.mxu0 %v785_v0  ;;  %p732_p7 = por %p731_p6, %p730_p5 }
  0x54   :  { %602 = vmatpush3.bf16.msra.mxu1 %v601_v12 }
  0x55   :  { %570 = vmatmul.mubr.msk.f32.vlgmr.msra.gmra.mrb[0].mxu0 %vm92_vm1, %v919_v8  ;;  %603 = vmatprep.subr.bf16.mxu1 %v785_v0  ;;  %p733_p8 = pnand %p732_p7, %p726_p4 }
  0x56   :  { %591 = vmatprep.mubr.msk.f32.mxu0 %vm786_vm0, %v787_v1  ;;  %608 = vmatpush3.bf16.msra.mxu0 %v607_v15 }
  0x57   :  { %609 = vmatprep.subr.bf16.mxu0 %v785_v0 }
  0xde   :  { %v177_v34 = vpop.xlane.xlu0 %176 }
  0xdf   :  { %v223_v36 = vrot.slane %v177_v34, %v203_v21  ;;  %v227_v38 = vrot.slane %v177_v34, %v226_v35 }
 0x128   :  { %v162_v18 = vpop.f32.mrb[0].mxu0 }
 0x129   :  { %v185_v19 = vrot.slane %v162_v18, %v184_v17  ;;  %v571_v20 = vpop.f32.mrb[1].mxu0 }
 0x12a   :  { %v339_v20 = vld [vmem:[#allocation7 + $0x18] sm:$0xff] }
 0x12b   :  { %v186_v22 = vcombine.high %v185_v19, %v185_v19  ;;  %v193_v23 = vrot.slane %v185_v19, %v184_v17  ;;  %v338_v19 = vld [vmem:[#allocation7 + $0x10] sm:$0xff] }
 0x12d   :  { %v200_v25 = vrot.slane %v186_v22, %v184_v17  ;;  %v204_v26 = vrot.slane %v193_v23, %v203_v21  ;;  %v343_v17 = vld [vmem:[#allocation8 + $0x18] sm:$0xff] }
 0x12e   :  { %v604_v18 = vpack.c.bf16 %v343_v17, %v342_v16 }
 0x12f   :  { %v211_v28 = vmul.f32 %v204_v26, %v930_v24  ;;  %v208_v29 = vrot.slane %v200_v25, %v203_v21 }
 0x130   :  { %605 = vmatpush3.bf16.msra.mxu1 %v604_v18 }
 0x131   :  { %v213_v30 = vsel %vm92_vm1, %v211_v28, 0.0  ;;  %v212_v31 = vmul.f32 %v208_v29, %v932_v27 }
 0x132   :  { %214 = vadd.xlane.f32.xlu0 %v213_v30 }
 0x133   :  { %v216_v32 = vsel %vm92_vm1, %v212_v31, 0.0  ;;  %581 = vmatmul.mubr.msk.f32.vlgmr.msra.gmra.mrb[0].mxu1 %vm92_vm1, %v919_v8 }
 0x134   :  { %217 = vadd.xlane.f32.xlu1 %v216_v32 }
 0x1bf   :  { %v215_v37 = vpop.xlane.xlu0 %214 }
 0x1c0   :  { %v230_v39 = vadd.f32 %v223_v36, %v215_v37 }
 0x1c1   :  { %v218_v40 = vpop.xlane.xlu1 %217 }
 0x1c2   :  { %v231_v41 = vadd.f32 %v227_v38, %v218_v40  ;;  %235 = vperm.xlu1 %625, %v230_v39  }
 0x1c4   :  { %238 = vperm.xlu0 %626, %v231_v41  }
 0x206   :  { %v410_v42 = vpop.f32.mrb[0].mxu1 }
 0x241   :  { %v236_v44 = vpop.permute.xlu1 %235 }
 0x242   :  { %v245_v46 = vrot.slane %v236_v44, %v938_v43 }
 0x243   :  { %v239_v45 = vpop.permute.xlu0 %238 }
 0x244   :  { %v249_v47 = vrot.slane %v239_v45, %v938_v43 }
 0x246   :  { %v251_v48 = vsel %vm250_vm3, %v249_v47, %v245_v46 }
 0x247   :  { %v254_v49 = vsel %vm253_vm4, %v251_v48, -inf }
 0x248   :  { %255 = vmax.xlane.f32.xlu1 %v254_v49 }
 0x2d5   :  { %v256_v50 = vpop.xlane.xlu1 %255 }
 0x2d6   :  { %v261_v51 = vrot.slane %v256_v50, %v203_v21  ;;  %v265_v52 = vrot.slane %v256_v50, %v226_v35 }
 0x2d8   :  { %v268_v53 = vsub.f32 %v230_v39, %v261_v51  ;;  %v269_v54 = vsub.f32 %v231_v41, %v265_v52 }
 0x2da   :  { %v270_v55 = vmul.f32 1.442695, %v268_v53  ;;  %v272_v56 = vmul.f32 1.442695, %v269_v54 }
 0x2dc   :  { %627 = vpow2.f32 %v270_v55 }
 0x2dd   :  { %629 = vpow2.f32 %v272_v56 }
 0x2e6   :  { %v628_v57 = vpop.eup %627 }
 0x2e7   :  { %277 = vperm.xlu0 %626, %v628_v57   ;;  %v630_v58 = vpop.eup %629 }
 0x2eb   :  { %280 = vperm.xlu0 %626, %v630_v58  }
 0x366   :  { %v278_v59 = vpop.permute.xlu0 %277 }
 0x367   :  { %v285_v61 = vrot.slane %v278_v59, %v938_v43 }
 0x36a   :  { %v281_v60 = vpop.permute.xlu0 %280 }
 0x36b   :  { %v289_v62 = vrot.slane %v281_v60, %v938_v43 }
 0x36d   :  { %v290_v63 = vsel %vm250_vm3, %v289_v62, %v285_v61 }
 0x36e   :  { %v292_v1 = vsel %vm253_vm4, %v290_v63, 0.0 }
 0x36f   :  { %293 = vadd.xlane.f32.xlu1 %v292_v1 }
 0x3fc   :  { %v294_v2 = vpop.xlane.xlu1 %293 }
 0x3fd   :  { %v299_v3 = vrot.slane %v294_v2, %v203_v21  ;;  %v303_v4 = vrot.slane %v294_v2, %v226_v35  ;;  %v610_v21 = vpack.c.bf16 %v339_v20, %v338_v19 }
 0x3ff   :  { %631 = vrcp.f32 %v299_v3  ;;  %611 = vmatpush3.bf16.msra.mxu0 %v610_v21 }
 0x400   :  { %633 = vrcp.f32 %v303_v4 }
 0x409   :  { %v632_v5 = vpop.eup %631 }
 0x40a   :  { %v634_v6 = vpop.eup %633  ;;  %v307_v7 = vmul.f32 %v632_v5, %v628_v57 }
 0x40b   :  { %v309_v9 = vmul.f32 %v634_v6, %v630_v58 }
 0x40c   :  { %312 = vperm.xlu0 %626, %v307_v7  }
 0x40d   :  { %317 = vperm.xlu1 %625, %v309_v9  }
 0x48b   :  { %v313_v22 = vpop.permute.xlu0 %312 }
 0x48c   :  { %v318_v23 = vpop.permute.xlu1 %317  ;;  %v320_v25 = vmul.f32 %v313_v22, %v930_v24  ;;  %v502_v26 = vrot.slane %v313_v22, %v938_v43 }
 0x48d   :  { %v321_v28 = vmul.f32 %v318_v23, %v932_v27  ;;  %v506_v29 = vrot.slane %v318_v23, %v938_v43  ;;  %v582_v43 = vpop.f32.mrb[1].mxu1 }
 0x48e   :  { %v322_v0 = vsel %vm92_vm1, %v320_v25, 0.0 }
 0x48f   :  { %v329_v30 = vsel %vm92_vm1, %v321_v28, 0.0  ;;  %v323_v31 = vrot.slane %v322_v0, 4  ;;  %v507_v32 = vsel %vm250_vm3, %v506_v29, %v502_v26 }
 0x490   :  { %v330_v33 = vrot.slane %v329_v30, 4  ;;  %509 = vst.msk [vmem:[#allocation11] sm:$0x3] %vm253_vm4, %v507_v32 }
 0x491   :  { %v324_v8 = vadd.f32 %v323_v31, %v322_v0 }
 0x492   :  { %v331_v34 = vadd.f32 %v330_v33, %v329_v30 }
 0x493   :  { %v325_v35 = vrot.slane %v324_v8, 2 }
 0x494   :  { %v332_v24 = vrot.slane %v331_v34, 2 }
 0x495   :  { %v326_v36 = vadd.f32 %v325_v35, %v324_v8 }
 0x496   :  { %v333_v37 = vadd.f32 %v332_v24, %v331_v34 }
 0x497   :  { %v327_v38 = vrot.slane %v326_v36, 1 }
 0x498   :  { %v334_v27 = vrot.slane %v333_v37, 1 }
 0x499   :  { %v328_v39 = vadd.f32 %v327_v38, %v326_v36 }
 0x49a   :  { %v335_v40 = vadd.f32 %v334_v27, %v333_v37 }
 0x49c   :  { %v416_v41 = vsel %vm250_vm3, %v335_v40, %v328_v39 }
 0x49d   :  { %592 = vmatmul.mubr.msk.f32.vlgmr.msra.gmra.mrb[2].mxu0 %vm92_vm1, %v416_v41 }
 0x49e   :  { %736 = shalt.err (!%p733_p8)
}
 0x49f   :  { %s737_s14 = scalar_lea.hbm %s998_s8, 32 }
 0x4a0   :  { %p738_p9 = scmp.ne.s32.totalorder %s998_s8, %s737_s14  ;;  %p741_p10 = scmp.lt.u32.totalorder %s737_s14, %s998_s8 }
 0x4a2   :  { %p743_p11 = pnand %p741_p10, %p738_p9 }
 0x4a4   :  { %746 = shalt.err (!%p743_p11)
}
 0x4a5   :  { %529 = dma.vmem_to_hbm [thread:$0]  %s527_s3, 32, %s998_s8, [#allocation12]   ;;  %v545_v45 = vld [vmem:[%s996_s6] ss:$0 sm:$0xff] }
 0x4a6   :  { %s791_s23 = smov [#allocation10]  }
 0x4a7   :  { %s516_s24 = sshll.u32 %s791_s23, 4  ;;  %s517_s24 = int_to_ptr.vmem [resolvable:$true] %s516_s24 }
 0x4a8   :  { %s747_s25 = scalar_lea.vmem %s517_s24, 32  ;;  %p752_p13 = scmp.lt.s32.totalorder %s517_s24, %s517_s24 }
 0x4a9   :  { %p748_p12 = scmp.ne.s32.totalorder %s517_s24, %s747_s25  ;;  %p753_p0 = scmp.lt.s32.totalorder %s747_s25, %s747_s25 }
 0x4ab   :  { %p754_p1 = por %p753_p0, %p752_p13 }
 0x4ad   :  { %p755_p2 = pnand %p754_p1, %p748_p12 }
 0x570   :  { %v485_v44 = vpop.f32.mrb[2].mxu0 }
 0x571   :  { %v486_v46 = vadd.f32 %v485_v44, %v410_v42  ;;  %v593_v47 = vpop.f32.mrb[3].mxu0 }
 0x573   :  { %v496_v48 = vadd.f32 %v545_v45, %v486_v46 }
 0x575   :  { %635 = vtanh.f32 %v496_v48 }
 0x57f   :  { %v636_v49 = vpop.eup %635 }
 0x580   :  { %498 = vst.msk [vmem:[#allocation10] sm:$0x3] %vm174_vm2, %v636_v49 }
 0x581   :  { %758 = shalt.err (!%p755_p2)
}
 0x582   :  { %s759_s6 = scalar_lea.hbm %s997_s7, 32 }
 0x583   :  { %p760_p3 = scmp.ne.s32.totalorder %s997_s7, %s759_s6  ;;  %p763_p4 = scmp.lt.u32.totalorder %s759_s6, %s997_s7 }
 0x585   :  { %p765_p5 = pnand %p763_p4, %p760_p3 }
 0x587   :  { %768 = shalt.err (!%p765_p5)
}
 0x588   :  { %519 = dma.vmem_to_hbm [thread:$0]  %s517_s24, 32, %s997_s7, [#allocation4]  }
 0x589   :  { %775 = dma.done.wait [#allocation4], 32  }
 0x58a   :  { %776 = vsyncadd [#allocation4], 4294967264 }
 0x58b   :  { %777 = dma.done.wait [#allocation12], 32  }
 0x58c   :  { %778 = vsyncadd [#allocation12], 4294967264 }
 0x58d   :  { %536 = vsyncpa [#allocation3], 1 }
 0x58e   :  { %537 = vsyncpa [#allocation6], 1 }
 0x58f   :  { %538 = vsyncpa [#allocation9], 1 }
 0x590   :  { %539 = vsyncpa [#allocation4], 1 }
 0x591   :  { %540 = vsyncpa [#allocation12], 1 }

</bundles_post_ra>
